<compile_context>
chip_gen: v7x
topology: tpu7x:2x2x1
jax: 0.10.0
libtpu: 0.0.40
codegen_flags: <defaults>
</compile_context>

<pallas_src>
import math

import jax
import jax.numpy as jnp
from jax.experimental import pallas as pl
from jax.experimental.pallas import tpu as pltpu


_VMEM_TILE_BUDGET = 40 * 1024 * 1024   # live pipeline buffers; fits v7x 64 MiB
_VMEM_LIMIT_BYTES = 48 * 1024 * 1024   # raise v5e(16MiB)/v6e-v7x(32MiB) default


def _largest_divisor_leq(n, cap, multiple=1):
    """Largest divisor d of n with d <= cap and d % multiple == 0, else None."""
    best = None
    cap = min(cap, n)
    for d in range(1, cap + 1):
        if n % d == 0 and d % multiple == 0:
            best = d
    return best


def _select_tiles(N, Cin, Cr2, P, bx, bw, bo):
    """Pick (nb, tm, tk, tp) under a VMEM budget.  Prefers lane-dense
    (multiple-of-128) pixel tiles; falls back to the largest divisor."""
    tp = (_largest_divisor_leq(P, 1024, 128) or _largest_divisor_leq(P, 1024))
    tm = Cr2 if Cr2 <= 1024 else (
        _largest_divisor_leq(Cr2, 1024, 256)
        or _largest_divisor_leq(Cr2, 1024, 128)
        or _largest_divisor_leq(Cr2, 1024))
    tk = Cin if Cin <= 512 else (
        _largest_divisor_leq(Cin, 512, 256)
        or _largest_divisor_leq(Cin, 512, 128)
        or _largest_divisor_leq(Cin, 512))
    # Fold several images into one grid step when the pixel tile is small
    # (amortizes the fixed ~0.35us/step overhead at low-resolution stages).
    nb = _largest_divisor_leq(N, max(1, 512 // tp)) or 1
    # ...but keep >= 2 parallel blocks when possible: v7x shards "parallel"
    # grid axes over its 2 TensorCores.
    if (N // nb) * (Cr2 // tm) * (P // tp) < 2:
        if nb > 1:
            nb = _largest_divisor_leq(N, nb // 2) or 1
        elif P // tp == 1 and tp >= 256:
            tp = (_largest_divisor_leq(P, tp // 2, 128)
                  or _largest_divisor_leq(P, tp // 2) or tp)

    def vmem_bytes(nb_, tm_, tk_, tp_):
        # double-buffered x / weight / bias / out blocks + f32 accumulator
        return (2 * nb_ * tk_ * tp_ * bx + 2 * tm_ * tk_ * bw + 2 * tm_ * 4
                + 2 * nb_ * tm_ * tp_ * bo + nb_ * tm_ * tp_ * 4)

    for _ in range(64):
        if vmem_bytes(nb, tm, tk, tp) <= _VMEM_TILE_BUDGET:
            break
        if nb > 1:
            nb = _largest_divisor_leq(N, nb // 2) or 1
            continue
        w_bytes = 2 * tm * tk * bw
        act_bytes = (2 * tk * bx + (2 * bo + 4) * tm) * tp * nb
        if w_bytes >= act_bytes and tk > 128:
            new_tk = (_largest_divisor_leq(Cin, tk // 2, 128)
                      or _largest_divisor_leq(Cin, tk // 2))
            if new_tk and new_tk < tk:
                tk = new_tk
                continue
        if tm > 128:
            new_tm = (_largest_divisor_leq(Cr2, tm // 2, 128)
                      or _largest_divisor_leq(Cr2, tm // 2))
            if new_tm and new_tm < tm:
                tm = new_tm
                continue
        if tp > 128:
            new_tp = (_largest_divisor_leq(P, tp // 2, 128)
                      or _largest_divisor_leq(P, tp // 2))
            if new_tp and new_tp < tp:
                tp = new_tp
                continue
        break
    return nb, tm, tk, tp


def _make_vpu_kernel(nb, cin):
    """Tiny-K path: unrolled broadcast-FMA on the VPU (avoids MXU push/pop
    cadence at ~3% K utilization).  f32 math regardless of input dtype."""

    def kernel(x_ref, w_ref, b_ref, o_ref):
        # x_ref: (Nb, Cin, TP)   w_ref: (Cr2, Cin)   b_ref: (Cr2, 1) f32
        # o_ref: (Nb, Cr2, TP)   (lane axis = pixels)
        w = w_ref[...].astype(jnp.float32)
        b = b_ref[...]
        for n in range(nb):                          # static unroll, Nb small
            x = x_ref[n].astype(jnp.float32)
            acc = w[:, 0:1] * x[0:1, :]
            for c in range(1, cin):
                acc = acc + w[:, c:c + 1] * x[c:c + 1, :]
            o_ref[n] = jnp.maximum(acc + b, 0.0).astype(o_ref.dtype)

    return kernel


def _make_mxu_kernel(nb):
    """General path: MXU matmul, f32 accumulation in VMEM scratch.  K (Cin) is
    the innermost grid axis; bias + ReLU applied once at the last K step."""

    def kernel(x_ref, w_ref, b_ref, o_ref, acc_ref):
        # x_ref: (Nb, TK, TP)   w_ref: (TM, TK)   b_ref: (TM, 1) f32
        # o_ref: (Nb, TM, TP)   acc_ref: (Nb, TM, TP) f32 scratch
        k = pl.program_id(3)

        @pl.when(k == 0)
        def _():
            acc_ref[...] = jnp.zeros_like(acc_ref)

        for n in range(nb):                          # static unroll, Nb small
            acc_ref[n] = acc_ref[n] + jnp.dot(
                w_ref[...], x_ref[n], preferred_element_type=jnp.float32)

        @pl.when(k == pl.num_programs(3) - 1)
        def _():
            y = acc_ref[...] + b_ref[...]            # (Nb,TM,TP) + (TM,1), f32
            o_ref[...] = jnp.maximum(y, 0.0).astype(o_ref.dtype)

    return kernel


def conv1x1_bias_relu(x_ncp, weight, bias2d, out_dtype=jnp.float32):
    """relu(weight @ x + bias) per image, in (channels, pixels) orientation.

    x_ncp:   (N, Cin, P)    consumed in its existing HBM dtype (no cast here)
    weight:  (Cr2, Cin)
    bias2d:  (Cr2, 1) float32
    returns: (N, Cr2, P) out_dtype
    """
    N, Cin, P = x_ncp.shape
    Cr2 = weight.shape[0]
    bx = jnp.dtype(x_ncp.dtype).itemsize
    bw = jnp.dtype(weight.dtype).itemsize
    bo = jnp.dtype(out_dtype).itemsize

    nb, tm, tk, tp = _select_tiles(N, Cin, Cr2, P, bx, bw, bo)

    cost = pl.CostEstimate(
        flops=2 * N * Cr2 * Cin * P,
        transcendentals=0,
        bytes_accessed=(N * Cin * P * bx + Cr2 * Cin * bw + Cr2 * 4
                        + N * Cr2 * P * bo))

    use_vpu = (Cin <= 8) and (tm == Cr2) and (tk == Cin)

    if use_vpu:
        grid = (N // nb, P // tp)
        return pl.pallas_call(
            _make_vpu_kernel(nb, Cin),
            out_shape=jax.ShapeDtypeStruct((N, Cr2, P), out_dtype),
            grid=grid,
            in_specs=[
                pl.BlockSpec((nb, Cin, tp), lambda n, p: (n, 0, p)),
                # Constant block index => weight/bias fetched once (resident).
                pl.BlockSpec((Cr2, Cin), lambda n, p: (0, 0)),
                pl.BlockSpec((Cr2, 1), lambda n, p: (0, 0)),
            ],
            out_specs=pl.BlockSpec((nb, Cr2, tp), lambda n, p: (n, 0, p)),
            compiler_params=pltpu.CompilerParams(
                dimension_semantics=("parallel", "parallel"),
                vmem_limit_bytes=_VMEM_LIMIT_BYTES),
            cost_estimate=cost,
        )(x_ncp, weight, bias2d)

    grid = (N // nb, Cr2 // tm, P // tp, Cin // tk)
    return pl.pallas_call(
        _make_mxu_kernel(nb),
        out_shape=jax.ShapeDtypeStruct((N, Cr2, P), out_dtype),
        grid=grid,
        in_specs=[
            pl.BlockSpec((nb, tk, tp), lambda n, m, p, k: (n, k, p)),
            pl.BlockSpec((tm, tk), lambda n, m, p, k: (m, k)),
            pl.BlockSpec((tm, 1), lambda n, m, p, k: (m, 0)),
        ],
        out_specs=pl.BlockSpec((nb, tm, tp), lambda n, m, p, k: (n, m, p)),
        scratch_shapes=[pltpu.VMEM((nb, tm, tp), jnp.float32)],
        compiler_params=pltpu.CompilerParams(
            dimension_semantics=("parallel", "parallel", "parallel",
                                 "arbitrary"),
            vmem_limit_bytes=_VMEM_LIMIT_BYTES),
        cost_estimate=cost,
    )(x_ncp, weight, bias2d)


def pixel_shuffle_icnr_forward(x_nchw, weight_oihw, bias, scale, *,
                               out_dtype=jnp.float32):
    """Forward pass matching PixelShuffle_ICNR: conv1x1 -> PixelShuffle -> ReLU.

    x_nchw:      (N, Cin, H, W)         consumed in its HBM dtype (no cast)
    weight_oihw: (Cout*scale^2, Cin, 1, 1)  (PyTorch Conv2d weight layout)
    bias:        (Cout*scale^2,)
    returns:     (N, Cout, H*scale, W*scale) out_dtype
    """
    N, Cin, H, W = x_nchw.shape
    Cr2 = weight_oihw.shape[0]
    Cout = Cr2 // (scale * scale)

    # Free reshape: NCHW is already (channels, pixels)-major per image.
    x = x_nchw.reshape(N, Cin, H * W)
    w = weight_oihw.reshape(Cr2, Cin)
    b = bias.reshape(Cr2, 1).astype(jnp.float32)     # bias tiny; f32 epilogue

    y = conv1x1_bias_relu(x, w, b, out_dtype=out_dtype)    # (N, Cr2, H*W)

    # PixelShuffle: out[n, c, h*r+i, w*r+j] = y[n, c*r^2 + i*r + j, h*W + w].
    # ReLU already applied (elementwise, commutes with the permutation).
    # TODO(synk): fuse this permutation into the kernel's output write (the
    # j-into-W lane interleave needs a lane-splitting relayout Mosaic does not
    # lower reliably); with out_dtype=bf16 this round trip is already halved.
    y = y.reshape(N, Cout, scale, scale, H, W)
    y = jnp.transpose(y, (0, 1, 4, 2, 5, 3))         # (N, C, H, i, W, j)
    return y.reshape(N, Cout, H * scale, W * scale)


def _reference(x_nchw, weight_oihw, bias, scale):
    """Pure-JAX reference of the same math (f32)."""
    N, Cin, H, W = x_nchw.shape
    Cr2 = weight_oihw.shape[0]
    Cout = Cr2 // (scale * scale)
    w2 = weight_oihw.reshape(Cr2, Cin).astype(jnp.float32)
    y = (jnp.einsum("nchw,oc->nohw", x_nchw.astype(jnp.float32), w2)
         + bias.astype(jnp.float32)[None, :, None, None])
    y = y.reshape(N, Cout, scale, scale, H, W)
    y = jnp.transpose(y, (0, 1, 4, 2, 5, 3)).reshape(
        N, Cout, H * scale, W * scale)
    return jnp.maximum(y, 0.0)


if __name__ == "__main__":
    key = jax.random.PRNGKey(0)

    def make_case(k, N, Cin, Cout, H, W, scale):
        kx, kw, kb = jax.random.split(k, 3)
        Cr2 = Cout * scale * scale
        x = jax.random.normal(kx, (N, Cin, H, W), dtype=jnp.float32)
        std = math.sqrt(2.0 / Cin)            # kaiming_normal_, fan_in = Cin
        w = std * jax.random.normal(kw, (Cr2, Cin, 1, 1), dtype=jnp.float32)
        bound = 1.0 / math.sqrt(Cin)          # Conv2d default bias init
        b = jax.random.uniform(kb, (Cr2,), minval=-bound, maxval=bound,
                               dtype=jnp.float32)
        return x, w, b

    k1, k2, k3 = jax.random.split(key, 3)

    # Case 1: module-consistent small shapes (batch=2, channels=4, spatial=16,
    # scale=2).  Tiny Cin -> VPU path, f32 end to end, exact semantics.
    x, w, b = make_case(k1, N=2, Cin=4, Cout=4, H=16, W=16, scale=2)
    out = jax.block_until_ready(pixel_shuffle_icnr_forward(x, w, b, 2))
    ref = _reference(x, w, b, 2)
    assert out.shape == (2, 4, 32, 32) and out.dtype == jnp.float32
    assert jnp.allclose(out, ref, atol=1e-5, rtol=1e-5)

    # Case 1b: activations/weights already bf16 in HBM + bf16 output (halves
    # HBM bytes on the dominant output side; no wrapper-side cast inside the
    # forward).  Loose tolerance covers bf16 rounding only.
    out_bf16 = jax.block_until_ready(
        pixel_shuffle_icnr_forward(x.astype(jnp.bfloat16),
                                   w.astype(jnp.bfloat16), b, 2,
                                   out_dtype=jnp.bfloat16))
    assert out_bf16.dtype == jnp.bfloat16
    assert jnp.allclose(out_bf16.astype(jnp.float32), ref, atol=1e-1, rtol=1e-1)

    # Case 2: deep-decoder-like channel counts (Cin=1024, Cr2=256) at 8x8 ->
    # MXU path with K (Cin) tiling, f32 accumulator scratch, pl.when
    # init/finalize.  Inputs made bf16-exact so default-precision MXU matmuls
    # stay ~exact vs. the reference.
    x2, w2, b2 = make_case(k2, N=1, Cin=1024, Cout=64, H=8, W=8, scale=2)
    x2 = x2.astype(jnp.bfloat16).astype(jnp.float32)
    w2 = w2.astype(jnp.bfloat16).astype(jnp.float32)
    out2 = jax.block_until_ready(pixel_shuffle_icnr_forward(x2, w2, b2, 2))
    ref2 = _reference(x2, w2, b2, 2)
    assert out2.shape == (1, 64, 16, 16)
    assert jnp.allclose(out2, ref2, atol=1e-3, rtol=1e-3)

    # Case 3: small feature map (8x8) with batch folding (several images per
    # grid step) to amortize per-step overhead; still 2 parallel grid blocks.
    x3, w3, b3 = make_case(k3, N=4, Cin=8, Cout=8, H=8, W=8, scale=2)
    out3 = jax.block_until_ready(pixel_shuffle_icnr_forward(x3, w3, b3, 2))
    ref3 = _reference(x3, w3, b3, 2)
    assert out3.shape == (4, 8, 16, 16)
    assert jnp.allclose(out3, ref3, atol=1e-5, rtol=1e-5)

    print("KERNEL_OK")
</pallas_src>

<mosaic_0001>
module attributes {stable_mosaic.version = 11 : i64} {
  func.func @kernel(%arg0: i32, %arg1: i32, %arg2: memref<1x4x256xf32, #tpu.memory_space<vmem>>, %arg3: memref<16x4xf32, #tpu.memory_space<vmem>>, %arg4: memref<16x1xf32, #tpu.memory_space<vmem>>, %arg5: memref<1x16x256xf32, #tpu.memory_space<vmem>>) attributes {dimension_semantics = [#tpu.dimension_semantics<parallel>, #tpu.dimension_semantics<parallel>], iteration_bounds = array<i64: 2, 1>, scalar_prefetch = 0 : i64, scratch_operands = 0 : i64, tpu.core_type = #tpu.core_type<tc>, window_params = [{transform_indices = @transform_0, window_bounds = array<i64: 1, 4, 256>}, {pipeline_mode = #tpu.pipeline_mode<synchronous>, transform_indices = @transform_1, window_bounds = array<i64: 16, 4>}, {pipeline_mode = #tpu.pipeline_mode<synchronous>, transform_indices = @transform_2, window_bounds = array<i64: 16, 1>}, {transform_indices = @transform_3, window_bounds = array<i64: 1, 16, 256>}]} {
    %c0 = arith.constant 0 : index
    %c0_0 = arith.constant 0 : index
    %0 = vector.load %arg3[%c0, %c0_0] : memref<16x4xf32, #tpu.memory_space<vmem>>, vector<16x4xf32>
    %c0_1 = arith.constant 0 : index
    %c0_2 = arith.constant 0 : index
    %1 = vector.load %arg4[%c0_1, %c0_2] : memref<16x1xf32, #tpu.memory_space<vmem>>, vector<16x1xf32>
    %c0_3 = arith.constant 0 : index
    %c0_4 = arith.constant 0 : index
    %c0_5 = arith.constant 0 : index
    %2 = vector.load %arg2[%c0_3, %c0_4, %c0_5] : memref<1x4x256xf32, #tpu.memory_space<vmem>>, vector<1x4x256xf32>
    %3 = vector.shape_cast %2 : vector<1x4x256xf32> to vector<4x256xf32>
    %4 = vector.extract_strided_slice %0 {offsets = [0, 0], sizes = [16, 1], strides = [1, 1]} : vector<16x4xf32> to vector<16x1xf32>
    %5 = vector.extract_strided_slice %3 {offsets = [0, 0], sizes = [1, 256], strides = [1, 1]} : vector<4x256xf32> to vector<1x256xf32>
    %6 = vector.broadcast %4 : vector<16x1xf32> to vector<16x256xf32>
    %7 = vector.broadcast %5 : vector<1x256xf32> to vector<16x256xf32>
    %8 = arith.mulf %6, %7 : vector<16x256xf32>
    %9 = vector.extract_strided_slice %0 {offsets = [0, 1], sizes = [16, 1], strides = [1, 1]} : vector<16x4xf32> to vector<16x1xf32>
    %10 = vector.extract_strided_slice %3 {offsets = [1, 0], sizes = [1, 256], strides = [1, 1]} : vector<4x256xf32> to vector<1x256xf32>
    %11 = vector.broadcast %9 : vector<16x1xf32> to vector<16x256xf32>
    %12 = vector.broadcast %10 : vector<1x256xf32> to vector<16x256xf32>
    %13 = arith.mulf %11, %12 : vector<16x256xf32>
    %14 = arith.addf %8, %13 : vector<16x256xf32>
    %15 = vector.extract_strided_slice %0 {offsets = [0, 2], sizes = [16, 1], strides = [1, 1]} : vector<16x4xf32> to vector<16x1xf32>
    %16 = vector.extract_strided_slice %3 {offsets = [2, 0], sizes = [1, 256], strides = [1, 1]} : vector<4x256xf32> to vector<1x256xf32>
    %17 = vector.broadcast %15 : vector<16x1xf32> to vector<16x256xf32>
    %18 = vector.broadcast %16 : vector<1x256xf32> to vector<16x256xf32>
    %19 = arith.mulf %17, %18 : vector<16x256xf32>
    %20 = arith.addf %14, %19 : vector<16x256xf32>
    %21 = vector.extract_strided_slice %0 {offsets = [0, 3], sizes = [16, 1], strides = [1, 1]} : vector<16x4xf32> to vector<16x1xf32>
    %22 = vector.extract_strided_slice %3 {offsets = [3, 0], sizes = [1, 256], strides = [1, 1]} : vector<4x256xf32> to vector<1x256xf32>
    %23 = vector.broadcast %21 : vector<16x1xf32> to vector<16x256xf32>
    %24 = vector.broadcast %22 : vector<1x256xf32> to vector<16x256xf32>
    %25 = arith.mulf %23, %24 : vector<16x256xf32>
    %26 = arith.addf %20, %25 : vector<16x256xf32>
    %27 = vector.broadcast %1 : vector<16x1xf32> to vector<16x256xf32>
    %28 = arith.addf %26, %27 : vector<16x256xf32>
    %cst = arith.constant 0.000000e+00 : f32
    %29 = vector.broadcast %cst : f32 to vector<16x256xf32>
    %30 = arith.maximumf %28, %29 : vector<16x256xf32>
    %c0_6 = arith.constant 0 : index
    %c0_7 = arith.constant 0 : index
    %c0_8 = arith.constant 0 : index
    %31 = vector.load %arg5[%c0_6, %c0_7, %c0_8] : memref<1x16x256xf32, #tpu.memory_space<vmem>>, vector<1x16x256xf32>
    %32 = vector.shape_cast %31 : vector<1x16x256xf32> to vector<16x256xf32>
    %33 = vector.shape_cast %30 : vector<16x256xf32> to vector<1x16x256xf32>
    tpu.vector_store %arg5[%c0_6, %c0_7, %c0_8], %33 {strides = array<i32>} : memref<1x16x256xf32, #tpu.memory_space<vmem>>, vector<1x16x256xf32>,
    return
  }
  func.func @transform_0(%arg0: i32, %arg1: i32) -> (i32, i32, i32) {
    %c0_i32 = arith.constant 0 : i32
    %c0_i32_0 = arith.constant 0 : i32
    return %arg0, %c0_i32, %arg1 : i32, i32, i32
  }
  func.func @transform_1(%arg0: i32, %arg1: i32) -> (i32, i32) {
    %c0_i32 = arith.constant 0 : i32
    %c0_i32_0 = arith.constant 0 : i32
    %c0_i32_1 = arith.constant 0 : i32
    return %c0_i32, %c0_i32_0 : i32, i32
  }
  func.func @transform_2(%arg0: i32, %arg1: i32) -> (i32, i32) {
    %c0_i32 = arith.constant 0 : i32
    %c0_i32_0 = arith.constant 0 : i32
    %c0_i32_1 = arith.constant 0 : i32
    return %c0_i32, %c0_i32_0 : i32, i32
  }
  func.func @transform_3(%arg0: i32, %arg1: i32) -> (i32, i32, i32) {
    %c0_i32 = arith.constant 0 : i32
    %c0_i32_0 = arith.constant 0 : i32
    return %arg0, %c0_i32, %arg1 : i32, i32, i32
  }
}

</mosaic_0001>

<bundles_post_ra>
// kernel: tpu_custom_call.1
= control target key start
LH: loop header
LB: loop body
LE: loop exit
PB: predicated region body
PF: predicated region fallthrough
CT: control target
= control target key end

     0   :  { %8 = vsyncpa [#allocation3], 0  ;;  %s779_s0 = inlined_call_operand.vmem [shape: f32[2,4,256], index: 0, kind: input, shape index: {}]   ;;  %s780_s1 = inlined_call_operand.vmem [shape: f32[16,4], index: 1, kind: input, shape index: {}]   ;;  %s781_s2 = inlined_call_operand.vmem [shape: f32[16,1], index: 2, kind: input, shape index: {}]   ;;  %s782_s3 = inlined_call_operand.hbm [shape: f32[2,16,256], index: 3, kind: output, shape index: {}]  }
   0x1   :  { %10 = vsyncpa [#allocation3 + $0x1], 0  ;;  %s648_s12 = smov 0   ;;  %s650_s13 = smov 0  }
   0x2   :  { %s652_s14 = smov 0   ;;  %s654_s15 = smov 0  }
   0x3   :  { %s656_s16 = smov 0   ;;  %s658_s17 = smov 0  }
   0x4 LB: > { %s457_s18 = sadd.s32 4294967295, %s619_s17   ;;  %s458_s19 = sadd.s32 4294967294, %s619_s17   ;;  %s619_s17 = sphi %s658_s17, %s16_s17   ;;  %s615_s16 = sphi %s656_s16, %s789_s16   ;;  %s611_s15 = sphi %s654_s15, %s788_s15   ;;  %s607_s14 = sphi %s652_s14, %s787_s14   ;;  %s603_s13 = sphi %s650_s13, %s786_s13   ;;  %s599_s12 = sphi %s648_s12, %s785_s12  }
   0x5   : > { %s28_s20 = sadd.s32 1, %s615_s16  ;;  %s107_s21 = sadd.s32 1, %s607_s14 }
   0x6   : > { %p30_p0 = scmp.ge.s32.totalorder %s28_s20, 2  ;;  %p117_p1 = scmp.ne.s32.totalorder %s607_s14, %s603_s13 }
   0x7   : > { %p118_p2 = scmp.eq.s32.totalorder %s457_s18, 1  ;;  %p123_p3 = scmp.ne.s32.totalorder %s603_s13, %s599_s12 }
   0x8   : > { %s791_s20 = smov (%p30_p0, %s28_s20), 0  ;;  %p124_p5 = scmp.eq.s32.totalorder %s458_s19, 1 }
   0x9   : > { %p688_p4 = por %p118_p2, %p117_p1  ;;  %s102_s23 = ssub.s32 %s615_s16, %s791_s20 }
   0xa   : > { %p461_p6 = scmp.ge.s32.totalorder %s619_s17, 1  ;;  %p105_p7 = scmp.eq.s32.totalorder %s102_s23, 0 }
   0xb   : > { %p695_p8 = por %p124_p5, %p123_p3  ;;  %p161_p9 = scmp.lt.s32.totalorder %s619_s17, 3 }
   0xc   : > { %s701_s25 = scalar_select %p105_p7, %s607_s14, %s107_s21  }
   0xd   : > { %p162_p10 = pnand %p461_p6, %p161_p9 }
   0xe   : > { %v200_v0 = vld [vmem:[%s780_s1] sm:$0xff] (!%p162_p10)  ;;  %v621_v1 = vmov (!%p162_p10), 1   ;;  %v622_v2 = vmov (!%p162_p10), 0   ;;  %v201_v3 = vld [vmem:[%s780_s1 + $0x8] sm:$0xff] (!%p162_p10)  ;;  %v623_v4 = vmov (!%p162_p10), 2   ;;  %v624_v5 = vmov (!%p162_p10), 3  }
   0xf   : > { %165 = sbr.rel (%p162_p10) target bundleno = 186 (0xba), region = 32  ;;  %534 = vset.pattern.permute.xlu1 (!%p162_p10), %v621_v1  ;;  %533 = vset.pattern.permute.xlu0 (!%p162_p10), %v622_v2  ;;  %v202_v6 = vld [vmem:[%s781_s2] sm:$0xff] (!%p162_p10)  ;;  %v203_v7 = vld [vmem:[%s781_s2 + $0x8] sm:$0xff] (!%p162_p10)  ;;  %p190_p11 = scmp.lt.s32.totalorder (!%p162_p10), %s611_s15, 1  ;;  %v216_v8 = vlaneseq (!%p162_p10) }
  0x10   : > { %239 = vperm.xlu1 (!%p162_p10), %534, %v200_v0   ;;  %207 = vperm.xlu0 (!%p162_p10), %533, %v200_v0   ;;  %s186_s18 = sand.u32 (!%p162_p10), 1, %s603_s13   ;;  %s471_s26 = sshll.u32 (!%p162_p10), %s611_s15, 9 }
  0x11   : > { %v217_v9 = vshrl.u32 (!%p162_p10), %v216_v8, 7  ;;  %s462_s19 = sshll.u32 (!%p162_p10), %s186_s18, 5  ;;  %s729_s29 = scalar_lea.hbm (!%p162_p10), %s782_s3, %s471_s26 }
  0x12   : > { %s188_s21 = scalar_lea.vmem (!%p162_p10), [#allocation2], %s462_s19  ;;  %s625_s4 = smov (!%p162_p10), [#allocation2]  }
  0x13   : > { %v248_v10 = vsub.s32 (!%p162_p10), 1, %v217_v9  ;;  %v252_v11 = vsub.s32 (!%p162_p10), 5, %v217_v9  ;;  %v218_v12 = vsub.s32 (!%p162_p10), 0, %v217_v9  ;;  %v222_v13 = vsub.s32 (!%p162_p10), 4, %v217_v9  ;;  %s378_s23 = sshll.u32 (!%p162_p10), %s188_s21, 4  ;;  %s545_s5 = sshll.u32 (!%p162_p10), %s625_s4, 4  ;;  %s724_s23 = int_to_ptr.vmem [resolvable:$true] %s378_s23  ;;  %s546_s5 = int_to_ptr.vmem [resolvable:$false] %s545_s5 }
  0x14   : > { %243 = vperm.xlu1 (!%p162_p10), %534, %v201_v3   ;;  %212 = vperm.xlu0 (!%p162_p10), %533, %v201_v3   ;;  %v282_v15 = vsub.s32 (!%p162_p10), 2, %v217_v9  ;;  %v286_v16 = vsub.s32 (!%p162_p10), 6, %v217_v9  ;;  %v316_v25 = vsub.s32 (!%p162_p10), 3, %v217_v9  ;;  %v320_v26 = vsub.s32 (!%p162_p10), 7, %v217_v9  ;;  %s541_s30 = scalar_lea.vmem (!%p162_p10), %s724_s23, 512  ;;  %s547_s6 = scalar_lea.vmem (!%p162_p10), %s546_s5, 1024 }
  0x15   : > { %p542_p12 = scmp.ne.s32.totalorder (!%p162_p10), %s724_s23, %s541_s30  ;;  %p548_p1 = scmp.lt.s32.totalorder (!%p162_p10), %s724_s23, %s546_s5 }
  0x16   : > { %s191_s7 = scalar_select %p190_p11, %s611_s15, 1 }
  0x17   : > { %s733_s15 = scalar_lea.sflag [#allocation3], %s186_s18  ;;  %p543_p13 = pnand %p542_p12, %p688_p4 }
  0x18   : > { %536 = vset.pattern.permute.xlu1 %v623_v4  ;;  %535 = vset.pattern.permute.xlu0 %v623_v4  ;;  %s470_s8 = sshll.u32 %s191_s7, 3  ;;  %p549_p2 = scmp.lt.s32.totalorder %s547_s6, %s541_s30 }
  0x19   : > { %277 = vperm.xlu1 %536, %v201_v3   ;;  %273 = vperm.xlu0 %535, %v200_v0   ;;  %s197_s11 = scalar_lea.vmem %s779_s0, %s470_s8  ;;  %p544_p0 = pneg %p543_p13 }
  0x1a   : > { %v204_v14 = vld [vmem:[%s197_s11] sm:$0xff]  ;;  %p550_p3 = por %p549_p2, %p548_p1 }
  0x1b   : > { %v249_v19 = vrot.slane %v204_v14, %v248_v10  ;;  %v253_v20 = vrot.slane %v204_v14, %v252_v11  ;;  %v219_v21 = vrot.slane %v204_v14, %v218_v12  ;;  %v223_v22 = vrot.slane %v204_v14, %v222_v13 }
  0x1c   : > { %v283_v23 = vrot.slane %v204_v14, %v282_v15  ;;  %v287_v24 = vrot.slane %v204_v14, %v286_v16  ;;  %v317_v35 = vrot.slane %v204_v14, %v316_v25  ;;  %v321_v36 = vrot.slane %v204_v14, %v320_v26  ;;  %p551_p5 = pnand %p550_p3, %p544_p0 }
  0x1d   : > { %537 = vset.pattern.permute.xlu1 %v624_v5  ;;  %538 = vset.pattern.permute.xlu0 %v624_v5  ;;  %v259_v29 = vrot.slane %v249_v19, %v248_v10  ;;  %v263_v30 = vrot.slane %v253_v20, %v248_v10  ;;  %v229_v31 = vrot.slane %v219_v21, %v218_v12 }
  0x1e   : > { %307 = vperm.xlu1 %537, %v200_v0   ;;  %311 = vperm.xlu0 %538, %v201_v3   ;;  %v233_v32 = vrot.slane %v223_v22, %v218_v12  ;;  %v293_v33 = vrot.slane %v283_v23, %v282_v15  ;;  %v297_v34 = vrot.slane %v287_v24, %v282_v15 }
  0x1f   : > { %v327_v45 = vrot.slane %v317_v35, %v316_v25  ;;  %v331_v46 = vrot.slane %v321_v36, %v316_v25 }
  0x22   : > { %539 = vset.pattern.permute.xlu1 %v622_v2  ;;  %540 = vset.pattern.permute.xlu0 %v622_v2 }
  0x23   : > { %342 = vperm.xlu1 %539, %v202_v6  }
  0x27   : > { %347 = vperm.xlu1 %539, %v203_v7  }
  0x8f   : > { %v240_v17 = vpop.permute.xlu1 %239  ;;  %v208_v18 = vpop.permute.xlu0 %207 }
  0x90   : > { %v264_v37 = vmul.f32 %v259_v29, %v240_v17  ;;  %v265_v38 = vmul.f32 %v263_v30, %v240_v17  ;;  %v234_v39 = vmul.f32 %v229_v31, %v208_v18  ;;  %v235_v40 = vmul.f32 %v233_v32, %v208_v18 }
  0x92   : > { %v268_v47 = vadd.f32 %v264_v37, %v234_v39  ;;  %v269_v48 = vadd.f32 %v265_v38, %v235_v40 }
  0x93   : > { %v244_v27 = vpop.permute.xlu1 %243  ;;  %v213_v28 = vpop.permute.xlu0 %212 }
  0x94   : > { %v266_v49 = vmul.f32 %v259_v29, %v244_v27  ;;  %v267_v50 = vmul.f32 %v263_v30, %v244_v27  ;;  %v236_v51 = vmul.f32 %v229_v31, %v213_v28  ;;  %v237_v52 = vmul.f32 %v233_v32, %v213_v28 }
  0x96   : > { %v270_v63 = vadd.f32 %v266_v49, %v236_v51  ;;  %v271_v0 = vadd.f32 %v267_v50, %v237_v52 }
  0x98   : > { %v278_v41 = vpop.permute.xlu1 %277  ;;  %v274_v42 = vpop.permute.xlu0 %273 }
  0x99   : > { %v298_v43 = vmul.f32 %v293_v33, %v274_v42  ;;  %v299_v44 = vmul.f32 %v297_v34, %v274_v42  ;;  %v300_v59 = vmul.f32 %v293_v33, %v278_v41  ;;  %v301_v60 = vmul.f32 %v297_v34, %v278_v41 }
  0x9b   : > { %v302_v54 = vadd.f32 %v298_v43, %v268_v47  ;;  %v303_v55 = vadd.f32 %v299_v44, %v269_v48  ;;  %v304_v4 = vadd.f32 %v300_v59, %v270_v63  ;;  %v305_v5 = vadd.f32 %v301_v60, %v271_v0 }
  0x9d   : > { %v308_v53 = vpop.permute.xlu1 %307  ;;  %v312_v58 = vpop.permute.xlu0 %311 }
  0x9e   : > { %v332_v56 = vmul.f32 %v327_v45, %v308_v53  ;;  %v333_v57 = vmul.f32 %v331_v46, %v308_v53  ;;  %v334_v1 = vmul.f32 %v327_v45, %v312_v58  ;;  %v335_v2 = vmul.f32 %v331_v46, %v312_v58 }
  0xa0   : > { %v336_v61 = vadd.f32 %v332_v56, %v302_v54  ;;  %v337_v62 = vadd.f32 %v333_v57, %v303_v55  ;;  %v338_v10 = vadd.f32 %v334_v1, %v304_v4  ;;  %v339_v11 = vadd.f32 %v335_v2, %v305_v5 }
  0xa2   : > { %v343_v3 = vpop.permute.xlu1 %342 }
  0xa3   : > { %v350_v6 = vadd.f32 %v343_v3, %v336_v61  ;;  %v351_v7 = vadd.f32 %v343_v3, %v337_v62 }
  0xa5   : > { %v354_v8 = vmax.f32 %v350_v6, 0.0  ;;  %v355_v9 = vmax.f32 %v351_v7, 0.0 }
  0xa6   : > { %v348_v12 = vpop.permute.xlu1 %347 }
  0xa7   : > { %358 = vst [vmem:[%s188_s21] sm:$0xff] %v354_v8  ;;  %359 = vst [vmem:[%s188_s21 + $0x8] sm:$0xff] %v355_v9  ;;  %v352_v13 = vadd.f32 %v348_v12, %v338_v10  ;;  %v353_v14 = vadd.f32 %v348_v12, %v339_v11 }
  0xa9   : > { %v356_v15 = vmax.f32 %v352_v13, 0.0  ;;  %v357_v16 = vmax.f32 %v353_v14, 0.0 }
  0xab   : > { %360 = vst [vmem:[%s188_s21 + $0x10] sm:$0xff] %v356_v15  ;;  %361 = vst [vmem:[%s188_s21 + $0x18] sm:$0xff] %v357_v16 }
  0xac   : > { %554 = shalt.err (!%p551_p5)
}
  0xad   : > { %s555_s7 = scalar_lea.hbm %s729_s29, 512  ;;  %s559_s10 = scalar_lea.hbm %s782_s3, 1024 }
  0xae   : > { %p556_p6 = scmp.ne.s32.totalorder %s729_s29, %s555_s7  ;;  %p560_p10 = scmp.lt.u32.totalorder %s729_s29, %s782_s3 }
  0xaf   : > { %p561_p11 = scmp.lt.u32.totalorder %s559_s10, %s555_s7  ;;  %p563_p13 = scmp.lt.u32.totalorder %s555_s7, %s729_s29 }
  0xb0   : > { %p557_p7 = pnand %p556_p6, %p688_p4 }
  0xb1   : > { %p562_p12 = por %p561_p11, %p560_p10 }
  0xb2   : > { %p558_p9 = pneg %p557_p7 }
  0xb3   : > { %p564_p0 = por %p563_p13, %p562_p12 }
  0xb5   : > { %p565_p1 = pnand %p564_p0, %p558_p9 }
  0xb7   : > { %568 = shalt.err (!%p565_p1)
}
  0xb8   : > { %s626_s19 = smov 256   ;;  %s627_s21 = smov 16  }
  0xb9   : > { %472 = dma.vmem_to_hbm [thread:$0]  (%p688_p4), %s724_s23, 512, %s729_s29, %s733_s15, %s626_s19, %s626_s19, %s627_s21  }
  0xba PF: > { %p478_p2 = scmp.ge.s32.totalorder %s619_s17, 2  ;;  %s393_s26 = sand.u32 1, %s599_s12  }
  0xbb   : > { %s394_s27 = scalar_lea.sflag [#allocation3], %s393_s26 }
  0xbc   : > { %p475_p3 = pnand %p478_p2, %p695_p8 }
  0xbe   : > { %594 = dma.done.wait (!%p475_p3), %s394_s27, 512  }
  0xbf   : > { %596 = vsyncadd (!%p475_p3), %s394_s27, 4294966784  ;;  %s16_s17 = sadd.s32 1, %s619_s17   ;;  %s785_s12 = smov %s603_s13 }
  0xc0   : > { %p13_p5 = scmp.ge.s32.totalorder %s16_s17, 4   ;;  %s786_s13 = smov %s607_s14 }
  0xc1   : > { %s787_s14 = smov %s701_s25  ;;  %s788_s15 = smov %s615_s16 }
  0xc2   : > { %s789_s16 = smov %s791_s20  ;;  %15 = sbr.rel (!%p13_p5) target bundleno = 4 (0x4), region = 67 }
  0xc9   :  { %399 = vsyncpa [#allocation3], 1 }
  0xca   :  { %401 = vsyncpa [#allocation3 + $0x1], 1 }

</bundles_post_ra>
